<compile_context>
chip_gen: v7x
topology: tpu7x:2x2x1
jax: 0.10.0
libtpu: 0.0.40
codegen_flags: <defaults>
</compile_context>

<pallas_src>
import math

import jax
import jax.numpy as jnp
from jax.experimental import pallas as pl
from jax.experimental.pallas import tpu as pltpu


def _round_up(x, m):
    return ((x + m - 1) // m) * m


# ---------------------------------------------------------------------------
# Kernel 1: fused Q/K linear projections, one batch element per grid step.
# ---------------------------------------------------------------------------
def _qk_proj_kernel(q_ref, k_ref, wq_ref, bq_ref, wk_ref, bk_ref,
                    qh_ref, kh_ref):
    # q_ref/k_ref   : (1, S, d_model) bf16
    # wq_ref/wk_ref : (d_model, d_model) bf16  (x @ W.T layout; scale folded
    #                 into wq/bq already), grid-resident (DMA'd once)
    # bq_ref/bk_ref : (1, d_model) f32
    # qh_ref/kh_ref : (1, S, d_model) bf16
    q = q_ref[0]
    k = k_ref[0]
    qh = jnp.dot(q, wq_ref[...], preferred_element_type=jnp.float32) + bq_ref[...]
    kh = jnp.dot(k, wk_ref[...], preferred_element_type=jnp.float32) + bk_ref[...]
    qh_ref[0] = qh.astype(qh_ref.dtype)
    kh_ref[0] = kh.astype(kh_ref.dtype)


# ---------------------------------------------------------------------------
# Kernel 2: scores + masked softmax for all heads of one (batch, q-tile).
# ---------------------------------------------------------------------------
def _attn_kernel(q_ref, k_ref, mask_ref, o_ref):
    # q_ref   : (1, h, block_q, d_k)   bf16  (already scaled by 1/sqrt(d_k))
    # k_ref   : (1, h, S_pad_k, d_k)   bf16  (constant over qi -> cached)
    # mask_ref: (1, block_q, S_pad_k)  int8  full mask, OR
    #           (1, 1, S_pad_k)        int8  key-validity vector (mask=None)
    # o_ref   : (1, h, block_q, S_pad_k)
    q = q_ref[0]                       # (h, block_q, d_k)
    k = k_ref[0]                       # (h, S_pad_k, d_k)

    # Batched last-dim contraction: MXU consumes the transposed-RHS form
    # directly -- no per-head lane slicing, no XLU transpose.
    scores = jnp.einsum("hqd,hkd->hqk", q, k,
                        preferred_element_type=jnp.float32)

    # Additive mask bias straight from int8 (no i8->f32 unpack). Shape is
    # (block_q, S_pad_k) for a full mask or (1, S_pad_k) for a key-validity
    # vector; broadcasting handles both.
    bias = jnp.where(mask_ref[0] == 0, jnp.float32(-1e9), jnp.float32(0.0))
    scores = scores + bias[None, :, :]

    # Numerically stable softmax over keys, all math in f32; exact division so
    # rows sum to 1 to f32 accuracy.
    m = jnp.max(scores, axis=-1, keepdims=True)
    e = jnp.exp(scores - m)
    denom = jnp.sum(e, axis=-1, keepdims=True)
    o_ref[0] = (e / denom).astype(o_ref.dtype)


def multi_head_attention(query, key, wq, bq, wk, bk, mask=None, *, h,
                         block_q=None, out_dtype=jnp.float32):
    """query/key: (B, S, d_model); wq/wk: (d_model, d_model) PyTorch (out,in);
       bq/bk: (d_model,); mask: (B, S, S) or None. Returns (B, h, S, S)."""
    B, S, d_model = query.shape
    assert d_model % h == 0
    d_k = d_model // h
    scale = 1.0 / math.sqrt(d_k)

    # y = x @ W.T + b ; the 1/sqrt(d_k) scale is folded into Wq / bq for free.
    wq_t = (wq.T * scale).astype(jnp.bfloat16)     # (d_model, d_model)
    wk_t = wk.T.astype(jnp.bfloat16)
    bq2 = (bq * scale).reshape(1, d_model).astype(jnp.float32)
    bk2 = bk.reshape(1, d_model).astype(jnp.float32)
    q_b = query.astype(jnp.bfloat16)
    k_b = key.astype(jnp.bfloat16)

    # ---- Projection kernel (K projected exactly once per batch element) ----
    qh, kh = pl.pallas_call(
        _qk_proj_kernel,
        out_shape=(jax.ShapeDtypeStruct((B, S, d_model), jnp.bfloat16),
                   jax.ShapeDtypeStruct((B, S, d_model), jnp.bfloat16)),
        grid_spec=pltpu.PrefetchScalarGridSpec(
            num_scalar_prefetch=0,
            grid=(B,),
            in_specs=[
                pl.BlockSpec((1, S, d_model), lambda b: (b, 0, 0)),
                pl.BlockSpec((1, S, d_model), lambda b: (b, 0, 0)),
                pl.BlockSpec((d_model, d_model), lambda b: (0, 0)),
                pl.BlockSpec((1, d_model), lambda b: (0, 0)),
                pl.BlockSpec((d_model, d_model), lambda b: (0, 0)),
                pl.BlockSpec((1, d_model), lambda b: (0, 0)),
            ],
            out_specs=(
                pl.BlockSpec((1, S, d_model), lambda b: (b, 0, 0)),
                pl.BlockSpec((1, S, d_model), lambda b: (b, 0, 0)),
            ),
        ),
        compiler_params=pltpu.CompilerParams(
            dimension_semantics=("parallel",)),
    )(q_b, k_b, wq_t, bq2, wk_t, bk2)

    # ---- Wrapper-side head split (layout plumbing, outside the hot kernel) --
    q_heads = qh.reshape(B, S, h, d_k).transpose(0, 2, 1, 3)   # (B, h, S, d_k)
    k_heads = kh.reshape(B, S, h, d_k).transpose(0, 2, 1, 3)

    # ---- Padding: lane-dense (multiple-of-128) key/score axis ----
    S_pad_k = _round_up(S, 128)
    if block_q is None:
        block_q = S if S <= 512 else 128      # bound VMEM on long sequences
    S_pad_q = _round_up(S, block_q)

    if S_pad_q > S:
        q_heads = jnp.pad(q_heads, ((0, 0), (0, 0), (0, S_pad_q - S), (0, 0)))
    if S_pad_k > S:
        k_heads = jnp.pad(k_heads, ((0, 0), (0, 0), (0, S_pad_k - S), (0, 0)))

    if mask is None:
        # AGGCN calls self.attn(outputs, outputs) with no mask: ship only a
        # key-validity vector so padded key columns get the -1e9 bias (no
        # B*S*S mask stream at all).
        mask_arr = (jnp.arange(S_pad_k) < S).astype(jnp.int8).reshape(1, 1, S_pad_k)
        mask_spec = pl.BlockSpec((1, 1, S_pad_k), lambda b, qi: (0, 0, 0))
    else:
        # NOTE: a fully-masked query row yields a uniform distribution over
        # S_pad_k (vs 1/S in the un-padded reference) -- same degenerate case
        # the PyTorch module also handles arbitrarily.
        mask_arr = (mask != 0).astype(jnp.int8)
        mask_arr = jnp.pad(mask_arr, ((0, 0), (0, S_pad_q - S), (0, S_pad_k - S)))
        mask_spec = pl.BlockSpec((1, block_q, S_pad_k), lambda b, qi: (b, qi, 0))

    # ---- Attention kernel ----
    out = pl.pallas_call(
        _attn_kernel,
        out_shape=jax.ShapeDtypeStruct((B, h, S_pad_q, S_pad_k), out_dtype),
        grid_spec=pltpu.PrefetchScalarGridSpec(
            num_scalar_prefetch=0,
            grid=(B, S_pad_q // block_q),
            in_specs=[
                pl.BlockSpec((1, h, block_q, d_k), lambda b, qi: (b, 0, qi, 0)),
                pl.BlockSpec((1, h, S_pad_k, d_k), lambda b, qi: (b, 0, 0, 0)),
                mask_spec,
            ],
            out_specs=pl.BlockSpec((1, h, block_q, S_pad_k),
                                   lambda b, qi: (b, 0, qi, 0)),
        ),
        compiler_params=pltpu.CompilerParams(
            dimension_semantics=("parallel", "parallel")),
    )(q_heads, k_heads, mask_arr)

    return out[:, :, :S, :S]


def _reference(query, key, wq, bq, wk, bk, mask, *, h):
    """Plain-JAX f32 reference matching the PyTorch forward (eval mode)."""
    B, S, d_model = query.shape
    d_k = d_model // h
    q = query @ wq.T + bq
    k = key @ wk.T + bk
    q = q.reshape(B, S, h, d_k).transpose(0, 2, 1, 3)
    k = k.reshape(B, S, h, d_k).transpose(0, 2, 1, 3)
    scores = jnp.einsum("bhqd,bhkd->bhqk", q, k) / math.sqrt(d_k)
    if mask is not None:
        scores = jnp.where(mask[:, None, :, :] == 0, -1000000000.0, scores)
    return jax.nn.softmax(scores, axis=-1)


if __name__ == "__main__":
    # Small shapes consistent with the module: h=4, d_model=32, d_k=8, seq=8.
    B, S, d_model, h = 2, 8, 32, 4

    key0 = jax.random.PRNGKey(0)
    kq, kk, kwq, kbq, kwk, kbk, kmask = jax.random.split(key0, 7)

    query = jax.random.normal(kq, (B, S, d_model), dtype=jnp.float32)
    key_in = jax.random.normal(kk, (B, S, d_model), dtype=jnp.float32)

    # Deterministic Linear params (PyTorch Linear stores W as (out, in)).
    bound = 1.0 / math.sqrt(d_model)
    wq = jax.random.uniform(kwq, (d_model, d_model), jnp.float32, -bound, bound)
    bq = jax.random.uniform(kbq, (d_model,), jnp.float32, -bound, bound)
    wk = jax.random.uniform(kwk, (d_model, d_model), jnp.float32, -bound, bound)
    bk = jax.random.uniform(kbk, (d_model,), jnp.float32, -bound, bound)

    # Binary mask (B, S, S), ~85% ones; force the diagonal to 1 so no row is
    # fully masked (degenerate case where any softmax output is arbitrary).
    mask = (jax.random.uniform(kmask, (B, S, S)) > 0.15).astype(jnp.float32)
    mask = jnp.maximum(mask, jnp.eye(S, dtype=jnp.float32)[None])

    # Masked path (general MultiHeadAttention forward).
    attn = multi_head_attention(query, key_in, wq, bq, wk, bk, mask, h=h)
    attn = jax.block_until_ready(attn)
    ref = _reference(query, key_in, wq, bq, wk, bk, mask, h=h)
    assert attn.shape == (B, h, S, S)
    assert jnp.allclose(attn, ref, atol=2e-2, rtol=2e-2), "mismatch vs reference (masked)"
    assert jnp.allclose(attn.sum(-1), 1.0, atol=1e-3), "softmax rows not normalized (masked)"

    # Unmasked path (how AGGCN.forward actually invokes self.attn).
    attn_nm = multi_head_attention(query, key_in, wq, bq, wk, bk, None, h=h)
    attn_nm = jax.block_until_ready(attn_nm)
    ref_nm = _reference(query, key_in, wq, bq, wk, bk, None, h=h)
    assert attn_nm.shape == (B, h, S, S)
    assert jnp.allclose(attn_nm, ref_nm, atol=2e-2, rtol=2e-2), "mismatch vs reference (no mask)"
    assert jnp.allclose(attn_nm.sum(-1), 1.0, atol=1e-3), "softmax rows not normalized (no mask)"

    print("KERNEL_OK")
</pallas_src>

<mosaic_0001>
module attributes {stable_mosaic.version = 11 : i64} {
  func.func @_qk_proj_kernel(%arg0: i32, %arg1: memref<1x8x32xbf16, #tpu.memory_space<vmem>>, %arg2: memref<1x8x32xbf16, #tpu.memory_space<vmem>>, %arg3: memref<32x32xbf16, #tpu.memory_space<vmem>>, %arg4: memref<1x32xf32, #tpu.memory_space<vmem>>, %arg5: memref<32x32xbf16, #tpu.memory_space<vmem>>, %arg6: memref<1x32xf32, #tpu.memory_space<vmem>>, %arg7: memref<1x8x32xbf16, #tpu.memory_space<vmem>>, %arg8: memref<1x8x32xbf16, #tpu.memory_space<vmem>>) attributes {dimension_semantics = [#tpu.dimension_semantics<parallel>], iteration_bounds = array<i64: 2>, scalar_prefetch = 0 : i64, scratch_operands = 0 : i64, tpu.core_type = #tpu.core_type<tc>, window_params = [{transform_indices = @transform_0, window_bounds = array<i64: 1, 8, 32>}, {transform_indices = @transform_1, window_bounds = array<i64: 1, 8, 32>}, {pipeline_mode = #tpu.pipeline_mode<synchronous>, transform_indices = @transform_2, window_bounds = array<i64: 32, 32>}, {pipeline_mode = #tpu.pipeline_mode<synchronous>, transform_indices = @transform_3, window_bounds = array<i64: 1, 32>}, {pipeline_mode = #tpu.pipeline_mode<synchronous>, transform_indices = @transform_4, window_bounds = array<i64: 32, 32>}, {pipeline_mode = #tpu.pipeline_mode<synchronous>, transform_indices = @transform_5, window_bounds = array<i64: 1, 32>}, {transform_indices = @transform_6, window_bounds = array<i64: 1, 8, 32>}, {transform_indices = @transform_7, window_bounds = array<i64: 1, 8, 32>}]} {
    %c0 = arith.constant 0 : index
    %c0_0 = arith.constant 0 : index
    %c0_1 = arith.constant 0 : index
    %0 = vector.load %arg1[%c0, %c0_0, %c0_1] : memref<1x8x32xbf16, #tpu.memory_space<vmem>>, vector<1x8x32xbf16>
    %1 = vector.shape_cast %0 : vector<1x8x32xbf16> to vector<8x32xbf16>
    %c0_2 = arith.constant 0 : index
    %c0_3 = arith.constant 0 : index
    %c0_4 = arith.constant 0 : index
    %2 = vector.load %arg2[%c0_2, %c0_3, %c0_4] : memref<1x8x32xbf16, #tpu.memory_space<vmem>>, vector<1x8x32xbf16>
    %3 = vector.shape_cast %2 : vector<1x8x32xbf16> to vector<8x32xbf16>
    %c0_5 = arith.constant 0 : index
    %c0_6 = arith.constant 0 : index
    %4 = vector.load %arg3[%c0_5, %c0_6] : memref<32x32xbf16, #tpu.memory_space<vmem>>, vector<32x32xbf16>
    %cst = arith.constant dense<0.000000e+00> : vector<8x32xf32>
    %5 = tpu.matmul %1, %4, %cst {dimension_numbers = #tpu.dot_dimension_numbers<[1], [0], [0], [1], [0, 0, 1, 1], [], []>} : vector<8x32xbf16>, vector<32x32xbf16>, vector<8x32xf32> -> vector<8x32xf32>
    %c0_7 = arith.constant 0 : index
    %c0_8 = arith.constant 0 : index
    %6 = vector.load %arg4[%c0_7, %c0_8] : memref<1x32xf32, #tpu.memory_space<vmem>>, vector<1x32xf32>
    %7 = vector.broadcast %6 : vector<1x32xf32> to vector<8x32xf32>
    %8 = arith.addf %5, %7 : vector<8x32xf32>
    %c0_9 = arith.constant 0 : index
    %c0_10 = arith.constant 0 : index
    %9 = vector.load %arg5[%c0_9, %c0_10] : memref<32x32xbf16, #tpu.memory_space<vmem>>, vector<32x32xbf16>
    %cst_11 = arith.constant dense<0.000000e+00> : vector<8x32xf32>
    %10 = tpu.matmul %3, %9, %cst_11 {dimension_numbers = #tpu.dot_dimension_numbers<[1], [0], [0], [1], [0, 0, 1, 1], [], []>} : vector<8x32xbf16>, vector<32x32xbf16>, vector<8x32xf32> -> vector<8x32xf32>
    %c0_12 = arith.constant 0 : index
    %c0_13 = arith.constant 0 : index
    %11 = vector.load %arg6[%c0_12, %c0_13] : memref<1x32xf32, #tpu.memory_space<vmem>>, vector<1x32xf32>
    %12 = vector.broadcast %11 : vector<1x32xf32> to vector<8x32xf32>
    %13 = arith.addf %10, %12 : vector<8x32xf32>
    %14 = arith.truncf %8 : vector<8x32xf32> to vector<8x32xbf16>
    %c0_14 = arith.constant 0 : index
    %c0_15 = arith.constant 0 : index
    %c0_16 = arith.constant 0 : index
    %15 = vector.load %arg7[%c0_14, %c0_15, %c0_16] : memref<1x8x32xbf16, #tpu.memory_space<vmem>>, vector<1x8x32xbf16>
    %16 = vector.shape_cast %15 : vector<1x8x32xbf16> to vector<8x32xbf16>
    %17 = vector.shape_cast %14 : vector<8x32xbf16> to vector<1x8x32xbf16>
    tpu.vector_store %arg7[%c0_14, %c0_15, %c0_16], %17 {strides = array<i32>} : memref<1x8x32xbf16, #tpu.memory_space<vmem>>, vector<1x8x32xbf16>,
    %18 = arith.truncf %13 : vector<8x32xf32> to vector<8x32xbf16>
    %c0_17 = arith.constant 0 : index
    %c0_18 = arith.constant 0 : index
    %c0_19 = arith.constant 0 : index
    %19 = vector.load %arg8[%c0_17, %c0_18, %c0_19] : memref<1x8x32xbf16, #tpu.memory_space<vmem>>, vector<1x8x32xbf16>
    %20 = vector.shape_cast %19 : vector<1x8x32xbf16> to vector<8x32xbf16>
    %21 = vector.shape_cast %18 : vector<8x32xbf16> to vector<1x8x32xbf16>
    tpu.vector_store %arg8[%c0_17, %c0_18, %c0_19], %21 {strides = array<i32>} : memref<1x8x32xbf16, #tpu.memory_space<vmem>>, vector<1x8x32xbf16>,
    return
  }
  func.func @transform_0(%arg0: i32) -> (i32, i32, i32) {
    %c0_i32 = arith.constant 0 : i32
    %c0_i32_0 = arith.constant 0 : i32
    %c0_i32_1 = arith.constant 0 : i32
    return %arg0, %c0_i32, %c0_i32_0 : i32, i32, i32
  }
  func.func @transform_1(%arg0: i32) -> (i32, i32, i32) {
    %c0_i32 = arith.constant 0 : i32
    %c0_i32_0 = arith.constant 0 : i32
    %c0_i32_1 = arith.constant 0 : i32
    return %arg0, %c0_i32, %c0_i32_0 : i32, i32, i32
  }
  func.func @transform_2(%arg0: i32) -> (i32, i32) {
    %c0_i32 = arith.constant 0 : i32
    %c0_i32_0 = arith.constant 0 : i32
    %c0_i32_1 = arith.constant 0 : i32
    return %c0_i32, %c0_i32_0 : i32, i32
  }
  func.func @transform_3(%arg0: i32) -> (i32, i32) {
    %c0_i32 = arith.constant 0 : i32
    %c0_i32_0 = arith.constant 0 : i32
    %c0_i32_1 = arith.constant 0 : i32
    return %c0_i32, %c0_i32_0 : i32, i32
  }
  func.func @transform_4(%arg0: i32) -> (i32, i32) {
    %c0_i32 = arith.constant 0 : i32
    %c0_i32_0 = arith.constant 0 : i32
    %c0_i32_1 = arith.constant 0 : i32
    return %c0_i32, %c0_i32_0 : i32, i32
  }
  func.func @transform_5(%arg0: i32) -> (i32, i32) {
    %c0_i32 = arith.constant 0 : i32
    %c0_i32_0 = arith.constant 0 : i32
    %c0_i32_1 = arith.constant 0 : i32
    return %c0_i32, %c0_i32_0 : i32, i32
  }
  func.func @transform_6(%arg0: i32) -> (i32, i32, i32) {
    %c0_i32 = arith.constant 0 : i32
    %c0_i32_0 = arith.constant 0 : i32
    %c0_i32_1 = arith.constant 0 : i32
    return %arg0, %c0_i32, %c0_i32_0 : i32, i32, i32
  }
  func.func @transform_7(%arg0: i32) -> (i32, i32, i32) {
    %c0_i32 = arith.constant 0 : i32
    %c0_i32_0 = arith.constant 0 : i32
    %c0_i32_1 = arith.constant 0 : i32
    return %arg0, %c0_i32, %c0_i32_0 : i32, i32, i32
  }
}

</mosaic_0001>

<bundles_post_ra>
// kernel: tpu_custom_call.1
= control target key start
LH: loop header
LB: loop body
LE: loop exit
PB: predicated region body
PF: predicated region fallthrough
CT: control target
= control target key end

     0   :  { %s1419_s0 = inlined_call_operand.hbm [shape: bf16[2,8,32], index: 0, kind: input, shape index: {}]   ;;  %s1420_s1 = inlined_call_operand.hbm [shape: bf16[2,8,32], index: 1, kind: input, shape index: {}]   ;;  %s1421_s2 = inlined_call_operand.hbm [shape: bf16[32,32], index: 2, kind: input, shape index: {}]   ;;  %s1422_s3 = inlined_call_operand.vmem [shape: f32[1,32], index: 3, kind: input, shape index: {}]   ;;  %s1423_s4 = inlined_call_operand.hbm [shape: bf16[32,32], index: 4, kind: input, shape index: {}]   ;;  %s1424_s5 = inlined_call_operand.vmem [shape: f32[1,32], index: 5, kind: input, shape index: {}]   ;;  %s1425_s6 = inlined_call_operand.hbm [shape: bf16[2,8,32], index: 6, kind: output, shape index: {0}]   ;;  %s1426_s7 = inlined_call_operand.hbm [shape: bf16[2,8,32], index: 7, kind: output, shape index: {1}]  }
   0x1   :  { %1432 = sst [smem:[#allocation21_spill]] %s1421_s2 }
   0x2   :  { %1433 = sst [smem:[#allocation22_spill]] %s1423_s4 }
   0x3   :  { %13 = vsyncpa [#allocation3], 0 }
   0x4   :  { %15 = vsyncpa [#allocation3 + $0x1], 0 }
   0x5   :  { %16 = vsyncpa [#allocation6], 0 }
   0x6   :  { %18 = vsyncpa [#allocation6 + $0x1], 0 }
   0x7   :  { %19 = vsyncpa [#allocation9], 0 }
   0x8   :  { %20 = vsyncpa [#allocation4], 0 }
   0x9   :  { %22 = vsyncpa [#allocation4 + $0x1], 0 }
   0xa   :  { %23 = vsyncpa [#allocation12], 0 }
   0xb   :  { %25 = vsyncpa [#allocation12 + $0x1], 0  ;;  %s1103_s24 = smov 0   ;;  %s1105_s25 = smov 0  }
   0xc   :  { %s1107_s26 = smov 0   ;;  %s1109_s27 = smov 0  }
   0xd LB: > { %1434 = sst [smem:[#allocation19_spill]] %s1047_s26  ;;  %s1124_s28 = sadd.s32 4294967295, %s1051_s27   ;;  %s1051_s27 = sphi %s1109_s27, %s1458_s27   ;;  %s1047_s26 = sphi %s1107_s26, %s1455_s26   ;;  %s1043_s25 = sphi %s1105_s25, %s1457_s25   ;;  %s1039_s24 = sphi %s1103_s24, %s1456_s24  }
   0xe   : > { %s688_s29 = sadd.s32 4294967294, %s1051_s27   ;;  %p51_p0 = scmp.ne.s32.totalorder %s1043_s25, %s1039_s24 }
   0xf   : > { %p1427_p1 = scmp.eq.s32.totalorder %s1124_s28, 0  ;;  %p191_p3 = scmp.eq.s32.totalorder %s688_s29, 1 }
  0x10   : > { %p689_p5 = scmp.ge.s32.totalorder %s1051_s27, 1  ;;  %p224_p7 = scmp.lt.s32.totalorder %s1051_s27, 3 }
  0x11   : > { %p1133_p4 = por %p1427_p1, %p51_p0  ;;  %p1138_p6 = por %p191_p3, %p51_p0 }
  0x12   : > { %p1143_p8 = pnand %p689_p5, %p224_p7  ;;  %s1053_s10 = smov [#allocation7]  }
  0x13   : > { %s1435_s30 = scalar_select %p1133_p4, 1, 0 }
  0x14   : > { %s1436_s8 = scalar_select %p1138_p6, 1, 0 }
  0x15   : > { %s1437_s9 = scalar_select %p1143_p8, 1, 0 }
  0x16   : > { %s236_s11 = sshll.u32 %s1053_s10, 4  ;;  %p756_p9 = pneg %p1143_p8  ;;  %s1147_s11 = int_to_ptr.vmem [resolvable:$true] %s236_s11 }
  0x17   : > { %s1054_s13 = smov [#allocation8]   ;;  %s1439_s2 = sld [smem:[#allocation21_spill]] }
  0x18   : > { %p1154_p11 = pnand %p756_p9, %p1427_p1  ;;  %s252_s14 = sshll.u32 %s1054_s13, 4  ;;  %s1158_s14 = int_to_ptr.vmem [resolvable:$true] %s252_s14 }
  0x1a   : > { %p827_p13 = pneg %p1154_p11 }
  0x1d   : > { %s825_s17 = scalar_lea.hbm %s1439_s2, 256 }
  0x1e   : > { %p826_p12 = scmp.ne.s32.totalorder %s1439_s2, %s825_s17  ;;  %p832_p5 = scmp.lt.u32.totalorder %s825_s17, %s1439_s2 }
  0x20   : > { %p828_p0 = pnand %p827_p13, %p826_p12 }
  0x22   : > { %p829_p3 = pneg %p828_p0 }
  0x24   : > { %p834_p7 = pnand %p832_p5, %p829_p3 }
  0x26   : > { %837 = shalt.err (!%p834_p7)
}
  0x27   : > { %s838_s22 = scalar_lea.vmem %s1147_s11, 256  ;;  %p846_p2 = scmp.lt.s32.totalorder %s1147_s11, %s1147_s11 }
  0x28   : > { %p839_p9 = scmp.ne.s32.totalorder %s1147_s11, %s838_s22  ;;  %p847_p12 = scmp.lt.s32.totalorder %s838_s22, %s838_s22 }
  0x2a   : > { %p841_p10 = pnand %p839_p9, %p827_p13  ;;  %p848_p0 = por %p847_p12, %p846_p2 }
  0x2c   : > { %p842_p1 = pneg %p841_p10 }
  0x2e   : > { %p849_p6 = pnand %p848_p0, %p842_p1 }
  0x30   : > { %852 = shalt.err (!%p849_p6)
}
  0x31   : > { %s1055_s23 = smov 64   ;;  %s1056_s29 = smov 4  }
  0x32   : > { %759 = dma.hbm_to_vmem [thread:$0]  (!%p1154_p11), %s1439_s2, 256, %s1147_s11, [#allocation6], %s1055_s23, %s1055_s23, %s1056_s29  }
  0x33   : > { %s1440_s4 = sld [smem:[#allocation22_spill]] }
  0x39   : > { %s853_s17 = scalar_lea.hbm %s1440_s4, 256 }
  0x3a   : > { %p854_p2 = scmp.ne.s32.totalorder %s1440_s4, %s853_s17  ;;  %p860_p10 = scmp.lt.u32.totalorder %s853_s17, %s1440_s4 }
  0x3c   : > { %p856_p1 = pnand %p854_p2, %p827_p13 }
  0x3e   : > { %p857_p6 = pneg %p856_p1 }
  0x40   : > { %p862_p3 = pnand %p860_p10, %p857_p6 }
  0x42   : > { %865 = shalt.err (!%p862_p3)
}
  0x43   : > { %s866_s11 = scalar_lea.vmem %s1158_s14, 256  ;;  %p874_p12 = scmp.lt.s32.totalorder %s1158_s14, %s1158_s14 }
  0x44   : > { %p867_p5 = scmp.ne.s32.totalorder %s1158_s14, %s866_s11  ;;  %p875_p0 = scmp.lt.s32.totalorder %s866_s11, %s866_s11 }
  0x46   : > { %p869_p7 = pnand %p867_p5, %p827_p13  ;;  %p876_p2 = por %p875_p0, %p874_p12 }
  0x48   : > { %p870_p9 = pneg %p869_p7 }
  0x4a   : > { %p877_p1 = pnand %p876_p2, %p870_p9 }
  0x4c   : > { %880 = shalt.err (!%p877_p1)
}
  0x4d   : > { %762 = dma.hbm_to_vmem [thread:$0]  (!%p1154_p11), %s1440_s4, 256, %s1158_s14, [#allocation9], %s1055_s23, %s1055_s23, %s1056_s29  }
  0x4e   : > { %s1213_s13 = sadd.s32 1, %s1051_s27   ;;  %s38_s12 = sadd.s32 1, %s1047_s26 }
  0x4f   : > { %s35_s15 = ssub.s32 %s1051_s27, %s1213_s13  ;;  %p45_p13 = scmp.ne.s32.totalorder %s1047_s26, %s1043_s25 }
  0x50   : > { %p36_p6 = scmp.eq.s32.totalorder %s35_s15, 0  ;;  %p46_p10 = scmp.eq.s32.totalorder %s1051_s27, 0 }
  0x51   : > { %p1441_p3 = scmp.eq.s32.totalorder %s1124_s28, 1  ;;  %p779_p7 = scmp.lt.s32.totalorder %s1051_s27, 2 }
  0x52   : > { %s1229_s17 = scalar_select %p36_p6, %s1047_s26, %s38_s12  }
  0x53   : > { %p1223_p5 = por %p1441_p3, %p45_p13  ;;  %p47_p9 = por %p46_p10, %p45_p13 }
  0x54   : > { %1443 = sst [smem:[#allocation20_spill]] %s1229_s17  ;;  %s269_s18 = sand.u32 1, %s1047_s26  }
  0x55   : > { %s1442_s16 = scalar_select %p1223_p5, 1, 0 }
  0x56   : > { %s1232_s14 = sshll.u32 %s269_s18, 2  ;;  %s694_s23 = sshll.u32 %s1051_s27, 6 }
  0x57   : > { %s1238_s20 = scalar_lea.hbm %s1419_s0, %s694_s23  ;;  %s273_s21 = scalar_lea.vmem [#allocation2], %s1232_s14 }
  0x58   : > { %s280_s11 = sshll.u32 %s273_s21, 4  ;;  %p1243_p11 = pnand %p779_p7, %p47_p9  ;;  %s1241_s11 = int_to_ptr.vmem [resolvable:$true] %s280_s11 }
  0x59   : > { %s1250_s15 = scalar_lea.hbm %s1420_s1, %s694_s23  ;;  %s287_s29 = sand.u32 1, %s1051_s27  }
  0x5a   : > { %s270_s19 = scalar_lea.sflag [#allocation3], %s269_s18  ;;  %s881_s2 = scalar_lea.hbm %s1238_s20, 64 }
  0x5b   : > { %p882_p12 = scmp.ne.s32.totalorder %s1238_s20, %s881_s2  ;;  %p883_p0 = pneg %p1243_p11 }
  0x5c   : > { %s886_s17 = scalar_lea.hbm %s1419_s0, 128  ;;  %p887_p13 = scmp.lt.u32.totalorder %s1238_s20, %s1419_s0 }
  0x5d   : > { %p884_p2 = pnand %p883_p0, %p882_p12  ;;  %p888_p6 = scmp.lt.u32.totalorder %s886_s17, %s881_s2 }
  0x5e   : > { %p890_p3 = scmp.lt.u32.totalorder %s881_s2, %s1238_s20 }
  0x5f   : > { %p885_p1 = pneg %p884_p2  ;;  %p889_p10 = por %p888_p6, %p887_p13 }
  0x61   : > { %p891_p7 = por %p890_p3, %p889_p10 }
  0x63   : > { %p892_p9 = pnand %p891_p7, %p885_p1 }
  0x65   : > { %895 = shalt.err (!%p892_p9)
}
  0x66   : > { %s896_s18 = scalar_lea.vmem %s1241_s11, 64  ;;  %s1057_s4 = smov [#allocation2]  }
  0x67   : > { %p897_p12 = scmp.ne.s32.totalorder %s1241_s11, %s896_s18  ;;  %s901_s23 = sshll.u32 %s1057_s4, 4  ;;  %s902_s23 = int_to_ptr.vmem [resolvable:$false] %s901_s23 }
  0x68   : > { %s903_s26 = scalar_lea.vmem %s902_s23, 128  ;;  %p904_p4 = scmp.lt.s32.totalorder %s1241_s11, %s902_s23 }
  0x69   : > { %p899_p2 = pnand %p897_p12, %p883_p0  ;;  %p905_p13 = scmp.lt.s32.totalorder %s903_s26, %s896_s18 }
  0x6b   : > { %p900_p5 = pneg %p899_p2  ;;  %p906_p6 = por %p905_p13, %p904_p4 }
  0x6d   : > { %p907_p10 = pnand %p906_p6, %p900_p5 }
  0x6f   : > { %910 = shalt.err (!%p907_p10)
}
  0x70   : > { %766 = dma.hbm_to_vmem [thread:$0]  (!%p1243_p11), %s1238_s20, 64, %s1241_s11, %s270_s19  }
  0x71   : > { %s291_s2 = scalar_lea.vmem [#allocation5], %s1232_s14  ;;  %s288_s12 = scalar_lea.sflag [#allocation6], %s287_s29 }
  0x72   : > { %s298_s17 = sshll.u32 %s291_s2, 4  ;;  %s911_s21 = scalar_lea.hbm %s1250_s15, 64  ;;  %s299_s17 = int_to_ptr.vmem [resolvable:$true] %s298_s17 }
  0x73   : > { %p912_p4 = scmp.ne.s32.totalorder %s1250_s15, %s911_s21  ;;  %s916_s4 = scalar_lea.hbm %s1420_s1, 128 }
  0x74   : > { %p917_p3 = scmp.lt.u32.totalorder %s1250_s15, %s1420_s1  ;;  %p918_p7 = scmp.lt.u32.totalorder %s916_s4, %s911_s21 }
  0x75   : > { %p914_p5 = pnand %p912_p4, %p883_p0  ;;  %p920_p12 = scmp.lt.u32.totalorder %s911_s21, %s1250_s15 }
  0x76   : > { %p919_p9 = por %p918_p7, %p917_p3 }
  0x77   : > { %p915_p1 = pneg %p914_p5 }
  0x78   : > { %p921_p2 = por %p920_p12, %p919_p9 }
  0x7a   : > { %p922_p13 = pnand %p921_p2, %p915_p1 }
  0x7c   : > { %925 = shalt.err (!%p922_p13)
}
  0x7d   : > { %s926_s14 = scalar_lea.vmem %s299_s17, 64  ;;  %s1058_s20 = smov [#allocation5]  }
  0x7e   : > { %p927_p6 = scmp.ne.s32.totalorder %s299_s17, %s926_s14  ;;  %s931_s11 = sshll.u32 %s1058_s20, 4  ;;  %s932_s11 = int_to_ptr.vmem [resolvable:$false] %s931_s11 }
  0x7f   : > { %s933_s29 = scalar_lea.vmem %s932_s11, 128  ;;  %p934_p5 = scmp.lt.s32.totalorder %s299_s17, %s932_s11 }
  0x80   : > { %p929_p10 = pnand %p927_p6, %p883_p0  ;;  %p935_p8 = scmp.lt.s32.totalorder %s933_s29, %s926_s14 }
  0x82   : > { %p930_p4 = pneg %p929_p10  ;;  %p936_p3 = por %p935_p8, %p934_p5 }
  0x84   : > { %p937_p7 = pnand %p936_p3, %p930_p4 }
  0x86   : > { %940 = shalt.err (!%p937_p7)
}
  0x87   : > { %769 = dma.hbm_to_vmem [thread:$0]  (!%p1243_p11), %s1250_s15, 64, %s299_s17, %s288_s12  }
  0x88   : > { %p1445_p1 = scmp.ne.s32.totalorder %s1437_s9, 0 }
  0x89   : > { %s1303_s19 = sand.u32 (!%p1445_p1), 1, %s1043_s25   ;;  %p1446_p8 = scmp.ne.s32.totalorder (!%p1445_p1), %s1435_s30, 0 }
  0x8a   : > { %307 = sbr.rel (%p1445_p1) target bundleno = 419 (0x1a3), region = 44  ;;  %s1306_s2 = sshll.u32 (!%p1445_p1), %s1303_s19, 2 }
  0x8b   : > { %s310_s21 = scalar_lea.sflag (!%p1445_p1), [#allocation3], %s1303_s19  ;;  %s313_s10 = scalar_lea.vmem (!%p1445_p1), [#allocation2], %s1306_s2 }
  0x91   : > { %1014 = dma.done.wait (%p1446_p8), %s310_s21, 64  }
  0x92   : > { %1016 = vsyncadd (%p1446_p8), %s310_s21, 4294967232  ;;  %s318_s9 = sand.u32 1, %s1124_s28   ;;  %s322_s15 = scalar_lea.vmem [#allocation5], %s1306_s2 }
  0x93   : > { %s319_s22 = scalar_lea.sflag [#allocation6], %s318_s9 }
  0x94   : > { %1018 = dma.done.wait (%p1446_p8), %s319_s22, 64  }
  0x95   : > { %1020 = vsyncadd (%p1446_p8), %s319_s22, 4294967232  ;;  %p1447_p11 = scmp.eq.s32.totalorder %s1124_s28, 0 }
  0x97   : > { %1022 = dma.done.wait (%p1447_p11), [#allocation6], 256   ;;  %p1448_p0 = pmov %p1447_p11 }
  0x99   : > { %1024 = vsyncadd (%p1448_p0), [#allocation6], 4294967040  ;;  %p1449_p9 = pmov %p1448_p0 }
  0x9a   : > { %p1450_p12 = pmov %p1448_p0 }
  0x9b   : > { %1026 = dma.done.wait (%p1449_p9), [#allocation9], 256  }
  0x9c   : > { %1028 = vsyncadd (%p1450_p12), [#allocation9], 4294967040  ;;  %v1059_v0 = vmov 0.0   ;;  %vm1060_vm0 = vmmov 0   ;;  %v821_v1 = vld [vmem:[#allocation7] sm:$0xff]   ;;  %v822_v2 = vld [vmem:[#allocation8] sm:$0xff]  }
  0x9d   : > { %724 = vmatprep.subr.bf16.mxu0 %v1059_v0  ;;  %732 = vmatprep.subr.bf16.mxu1 %v1059_v0  ;;  %v823_v3 = vld [vmem:[#allocation7 + $0x8] sm:$0xff]   ;;  %v824_v4 = vld [vmem:[#allocation8 + $0x8] sm:$0xff]   ;;  %v372_v5 = vld [vmem:[%s313_s10] sm:$0xf]  ;;  %vm397_vm1 = vcmask 261120   ;;  %s714_s4 = sshll.u32 %s1124_s28, 6 }
  0x9e   : > { %728 = vmatprep.mubr.msk.bf16.mxu0 %vm1060_vm0, %v1059_v0  ;;  %736 = vmatprep.mubr.msk.bf16.mxu1 %vm1060_vm0, %v1059_v0  ;;  %v373_v6 = vld [vmem:[%s322_s15] sm:$0xf]  ;;  %v704_v7 = vld [vmem:[%s1422_s3] ss:$0 sm:$0xff]  ;;  %s363_s23 = scalar_lea.vmem [#allocation10], %s1306_s2  ;;  %s370_s14 = scalar_lea.vmem [#allocation11], %s1306_s2 }
  0x9f   : > { %725 = vmatpush3.bf16.msra.mxu0 %v821_v1  ;;  %733 = vmatpush3.bf16.msra.mxu1 %v822_v2  ;;  %v708_v8 = vld [vmem:[%s1424_s5] ss:$0 sm:$0xff]  ;;  %s531_s26 = sshll.u32 %s363_s23, 4  ;;  %s544_s20 = sshll.u32 %s370_s14, 4  ;;  %vm508_vm2 = vcmask 257024   ;;  %s1344_s26 = int_to_ptr.vmem [resolvable:$true] %s531_s26  ;;  %s1351_s20 = int_to_ptr.vmem [resolvable:$true] %s544_s20 }
  0xa0   : > { %726 = vmatprep.subr.bf16.mxu0 %v1059_v0  ;;  %734 = vmatprep.subr.bf16.mxu1 %v1059_v0  ;;  %s1342_s21 = scalar_lea.hbm %s1425_s6, %s714_s4  ;;  %s1349_s9 = scalar_lea.hbm %s1426_s7, %s714_s4 }
  0xa1   : > { %s513_s22 = scalar_lea.sflag [#allocation4], %s1303_s19  ;;  %s941_s15 = scalar_lea.vmem %s1344_s26, 64 }
  0xa2   : > { %p942_p2 = scmp.ne.s32.totalorder %s1344_s26, %s941_s15  ;;  %p1451_p13 = scmp.ne.s32.totalorder %s1442_s16, 0 }
  0xa3   : > { %727 = vmatpush3.bf16.msra.mxu0 %v823_v3  ;;  %735 = vmatpush3.bf16.msra.mxu1 %v824_v4  ;;  %s1061_s30 = smov [#allocation10]  }
  0xa4   : > { %p943_p6 = pnand %p942_p2, %p1451_p13  ;;  %s945_s17 = sshll.u32 %s1061_s30, 4  ;;  %s946_s17 = int_to_ptr.vmem [resolvable:$false] %s945_s17 }
  0xa5   : > { %s947_s12 = scalar_lea.vmem %s946_s17, 128  ;;  %p948_p4 = scmp.lt.s32.totalorder %s1344_s26, %s946_s17 }
  0xa6   : > { %729 = vmatmul.mubr.msk.bf16.vlgmr.msra.gmra.mrb[0].mxu0 %vm397_vm1, %v372_v5  ;;  %737 = vmatmul.mubr.msk.bf16.vlgmr.msra.gmra.mrb[0].mxu1 %vm397_vm1, %v373_v6  ;;  %p944_p10 = pneg %p943_p6  ;;  %p949_p5 = scmp.lt.s32.totalorder %s947_s12, %s941_s15 }
  0xa8   : > { %p950_p3 = por %p949_p5, %p948_p4 }
  0xaa   : > { %p951_p7 = pnand %p950_p3, %p944_p10 }
 0x179   : > { %v435_v9 = vpop.f32.mrb[0].mxu0  ;;  %v501_v11 = vpop.f32.mrb[0].mxu1 }
 0x17a   : > { %v436_v10 = vadd.f32 %v704_v7, %v435_v9  ;;  %v730_v12 = vpop.f32.mrb[1].mxu0  ;;  %v502_v13 = vadd.f32 %v708_v8, %v501_v11  ;;  %v738_v14 = vpop.f32.mrb[1].mxu1 }
 0x17b   : > { %v438_v15 = vpop.f32.mrb[2].mxu0  ;;  %v504_v17 = vpop.f32.mrb[2].mxu1 }
 0x17c   : > { %v507_v16 = vpack.c.bf16 %v436_v10, %v436_v10  ;;  %v731_v18 = vpop.f32.mrb[3].mxu0  ;;  %v510_v19 = vpack.c.bf16 %v502_v13, %v502_v13  ;;  %v739_v20 = vpop.f32.mrb[3].mxu1 }
 0x17e   : > { %509 = vst.msk [vmem:[%s363_s23] sm:$0xf] %vm508_vm2, %v507_v16 }
 0x17f   : > { %954 = shalt.err (!%p951_p7)
}
 0x180   : > { %s955_s18 = scalar_lea.hbm %s1342_s21, 64  ;;  %s959_s11 = scalar_lea.hbm %s1425_s6, 128 }
 0x181   : > { %p956_p1 = scmp.ne.s32.totalorder %s1342_s21, %s955_s18  ;;  %p960_p0 = scmp.lt.u32.totalorder %s1342_s21, %s1425_s6 }
 0x182   : > { %p961_p9 = scmp.lt.u32.totalorder %s959_s11, %s955_s18  ;;  %p963_p2 = scmp.lt.u32.totalorder %s955_s18, %s1342_s21 }
 0x183   : > { %p957_p8 = pnand %p956_p1, %p1451_p13 }
 0x184   : > { %p962_p12 = por %p961_p9, %p960_p0 }
 0x185   : > { %p958_p11 = pneg %p957_p8 }
 0x186   : > { %p964_p6 = por %p963_p2, %p962_p12 }
 0x188   : > { %p965_p10 = pnand %p964_p6, %p958_p11 }
 0x18a   : > { %968 = shalt.err (!%p965_p10)
}
 0x18b   : > { %752 = dma.vmem_to_hbm [thread:$0]  (%p1451_p13), %s1344_s26, 64, %s1342_s21, %s513_s22   ;;  %511 = vst.msk [vmem:[%s370_s14] sm:$0xf] %vm508_vm2, %v510_v19 }
 0x18c   : > { %s518_s10 = scalar_lea.sflag [#allocation12], %s1303_s19  ;;  %s969_s15 = scalar_lea.vmem %s1351_s20, 64 }
 0x18d   : > { %p970_p4 = scmp.ne.s32.totalorder %s1351_s20, %s969_s15  ;;  %s1062_s30 = smov [#allocation11]  }
 0x18e   : > { %s973_s17 = sshll.u32 %s1062_s30, 4  ;;  %s974_s17 = int_to_ptr.vmem [resolvable:$false] %s973_s17 }
 0x18f   : > { %p971_p5 = pnand %p970_p4, %p1451_p13  ;;  %s975_s12 = scalar_lea.vmem %s974_s17, 128 }
 0x190   : > { %p976_p7 = scmp.lt.s32.totalorder %s1351_s20, %s974_s17  ;;  %p977_p1 = scmp.lt.s32.totalorder %s975_s12, %s969_s15 }
 0x191   : > { %p972_p3 = pneg %p971_p5 }
 0x192   : > { %p978_p8 = por %p977_p1, %p976_p7 }
 0x194   : > { %p979_p11 = pnand %p978_p8, %p972_p3 }
 0x196   : > { %982 = shalt.err (!%p979_p11)
}
 0x197   : > { %s983_s19 = scalar_lea.hbm %s1349_s9, 64  ;;  %s987_s14 = scalar_lea.hbm %s1426_s7, 128 }
 0x198   : > { %p984_p0 = scmp.ne.s32.totalorder %s1349_s9, %s983_s19  ;;  %p988_p2 = scmp.lt.u32.totalorder %s1349_s9, %s1426_s7 }
 0x199   : > { %p989_p6 = scmp.lt.u32.totalorder %s987_s14, %s983_s19  ;;  %p991_p4 = scmp.lt.u32.totalorder %s983_s19, %s1349_s9 }
 0x19a   : > { %p985_p9 = pnand %p984_p0, %p1451_p13 }
 0x19b   : > { %p990_p10 = por %p989_p6, %p988_p2 }
 0x19c   : > { %p986_p12 = pneg %p985_p9 }
 0x19d   : > { %p992_p5 = por %p991_p4, %p990_p10 }
 0x19f   : > { %p993_p3 = pnand %p992_p5, %p986_p12 }
 0x1a1   : > { %996 = shalt.err (!%p993_p3)
}
 0x1a2   : > { %753 = dma.vmem_to_hbm [thread:$0]  (%p1451_p13), %s1351_s20, 64, %s1349_s9, %s518_s10  }
 0x1a3 PF: > { %s556_s18 = sand.u32 1, %s1039_s24   ;;  %p1452_p7 = scmp.ne.s32.totalorder %s1436_s8, 0 }
 0x1a4   : > { %p1453_p1 = scmp.ge.s32.totalorder %s1051_s27, 2  ;;  %s557_s4 = scalar_lea.sflag [#allocation4], %s556_s18 }
 0x1a6   : > { %p771_p8 = pnand %p1453_p1, %p1452_p7 }
 0x1a8   : > { %1030 = dma.done.wait (!%p771_p8), %s557_s4, 64  }
 0x1a9   : > { %1032 = vsyncadd (!%p771_p8), %s557_s4, 4294967232  ;;  %s566_s23 = scalar_lea.sflag [#allocation12], %s556_s18 }
 0x1aa   : > { %1034 = dma.done.wait (!%p771_p8), %s566_s23, 64  }
 0x1ab   : > { %1036 = vsyncadd (!%p771_p8), %s566_s23, 4294967232  ;;  %s1454_s16 = sld [smem:[#allocation19_spill]]  ;;  %s1455_s26 = sld [smem:[#allocation20_spill]] }
 0x1ac   : > { %p28_p13 = scmp.ge.s32.totalorder %s1213_s13, 4   ;;  %s1456_s24 = smov %s1043_s25 }
 0x1ad   : > { %s1458_s27 = smov %s1213_s13 }
 0x1ae   :  { %30 = sbr.rel (!%p28_p13) target bundleno = 13 (0xd), region = 127 }
 0x1b1   : > { %s1457_s25 = smov %s1454_s16 }
 0x1b5   :  { %571 = vsyncpa [#allocation3], 1 }
 0x1b6   :  { %573 = vsyncpa [#allocation3 + $0x1], 1 }
 0x1b7   :  { %574 = vsyncpa [#allocation6], 1 }
 0x1b8   :  { %576 = vsyncpa [#allocation6 + $0x1], 1 }
 0x1b9   :  { %577 = vsyncpa [#allocation9], 1 }
 0x1ba   :  { %578 = vsyncpa [#allocation4], 1 }
 0x1bb   :  { %580 = vsyncpa [#allocation4 + $0x1], 1 }
 0x1bc   :  { %581 = vsyncpa [#allocation12], 1 }
 0x1bd   :  { %583 = vsyncpa [#allocation12 + $0x1], 1 }

</bundles_post_ra>
